<compile_context>
chip_gen: v7x
topology: tpu7x:2x2x1
jax: 0.10.0
libtpu: 0.0.40
codegen_flags: <defaults>
</compile_context>

<pallas_src>
import functools

import jax
import jax.numpy as jnp
from jax.experimental import pallas as pl
from jax.experimental.pallas import tpu as pltpu


def _round_up(x, m):
    return (x + m - 1) // m * m


def _cdiv(a, b):
    return -(-a // b)


def _vmem_limit_bytes(est_bytes):
    """Generation-aware VMEM request: ~85% of physical capacity, sane floor."""
    try:
        cap = int(pltpu.get_tpu_info().vmem_capacity_bytes)
    except Exception:  # conservative fallback that is safe on every generation
        cap = 64 * 1024 * 1024
    want = max(32 * 1024 * 1024, int(1.5 * est_bytes))
    return int(min(int(0.85 * cap), want))


def _uq_project_kernel(*refs, apply_dropout):
    # Per-batch grid step:
    #   q_ref    : (1, Lq, I)  question                (compute dtype)
    #   w_ref    : (I, H)      U weight, transposed    (compute dtype)
    #   d_ref    : (1, H)      D parameter             (f32)
    #   drop_ref : (1, 1, I)   pre-scaled keep mask    (training only)
    #   uq_ref   : (1, Lq, H)  output Uq = D*relu(q@W^T)
    if apply_dropout:
        q_ref, w_ref, d_ref, drop_ref, uq_ref = refs
    else:
        q_ref, w_ref, d_ref, uq_ref = refs
        drop_ref = None

    q = q_ref[0]                                                        # (Lq, I)
    if apply_dropout:
        q = q * drop_ref[0]
    uq = jnp.maximum(
        jnp.dot(q, w_ref[...], preferred_element_type=jnp.float32), 0.0)
    uq_ref[0] = (uq * d_ref[...]).astype(uq_ref.dtype)                  # (Lq, H)


def _full_attention_kernel(*refs, apply_dropout, approx_recip):
    # Per (batch b, Lp-tile l) grid step:
    #   p_ref    : (1, TLP, I)   passage tile          (compute dtype)
    #   w_ref    : (I, H)        U weight, transposed  (single-buffered)
    #   uq_ref   : (1, Lq, H)    precomputed Uq        (single-buffered)
    #   bias_ref : (1, 1, Lq)    additive mask bias    (f32, -1e30 on masked cols)
    #   rep_ref  : (1, Lq, R)                          (single-buffered)
    #   drop_ref : (1, 1, I)     pre-scaled keep mask  (training only)
    #   o_ref    : (1, TLP, R)
    if apply_dropout:
        p_ref, w_ref, uq_ref, bias_ref, rep_ref, drop_ref, o_ref = refs
    else:
        p_ref, w_ref, uq_ref, bias_ref, rep_ref, o_ref = refs
        drop_ref = None

    p = p_ref[0]                                                        # (TLP, I)
    if apply_dropout:
        p = p * drop_ref[0]
    up = jnp.maximum(
        jnp.dot(p, w_ref[...], preferred_element_type=jnp.float32), 0.0)

    # scores = Up @ Uq^T via a direct H-axis contraction — the canonical
    # flash-attention (M,K)x(N,K) MXU feed; no materialized transpose.
    scores = jax.lax.dot_general(
        up.astype(uq_ref.dtype), uq_ref[0],
        dimension_numbers=(((1,), (1,)), ((), ())),
        preferred_element_type=jnp.float32)                             # (TLP, Lq)
    scores = scores + bias_ref[0]                                       # mask bias

    # Softmax over the question axis; normalization folded into the output scale.
    # TODO(synk): for very long Lq, add an "arbitrary" Lq-tile grid axis with an
    # online (flash-style) softmax so Lq-sized blocks need not be VMEM-resident.
    m = jnp.max(scores, axis=-1, keepdims=True)
    e = jnp.exp(scores - m)
    s = jnp.sum(e, axis=-1, keepdims=True)

    out = jnp.dot(e.astype(rep_ref.dtype), rep_ref[0],
                  preferred_element_type=jnp.float32)                   # (TLP, R)
    o_ref[0] = (out * pl.reciprocal(s, approx=approx_recip)).astype(o_ref.dtype)


def full_attention_pallas(passage, q_mask, question, rep, u_weight, d_param,
                          drop_mask=None, *, compute_dtype=jnp.bfloat16,
                          out_dtype=None, lp_tile=256):
    """passage (B,Lp,I), q_mask (B,Lq) bool (True = padded), question (B,Lq,I),
    rep (B,Lq,R), u_weight (H,I), d_param (1,H), drop_mask (B,1,I) pre-scaled or None.

    Notes:
      * fully-masked question rows produce a near-uniform softmax (finite -1e30
        bias) instead of the PyTorch reference's NaNs (-inf mask) — intentional.
      * lp_tile: 256 is a good default everywhere; on v6e (128 MiB VMEM) it can
        be swept toward 512, on v5e keep it in the 128-256 range.
    """
    B, Lp, I = passage.shape
    _, Lq, _ = question.shape
    H = u_weight.shape[0]
    R = rep.shape[-1]
    out_dtype = out_dtype or passage.dtype
    cd = compute_dtype
    training = drop_mask is not None

    # Lane dims padded to 128 (lane-dense vregs, unmasked stores).  Lp tile is a
    # balanced multiple of 16 (bf16 sublane packing, no badly-padded last tile).
    I_p = _round_up(I, 128)
    H_p = _round_up(H, 128)
    R_p = _round_up(R, 128)
    Lq_p = _round_up(Lq, 128)
    n_lp_tiles = max(1, _cdiv(Lp, lp_tile))
    tlp = _round_up(_cdiv(Lp, n_lp_tiles), 16)
    Lp_p = _round_up(Lp, tlp)
    n_lp_tiles = Lp_p // tlp

    def pad_to(x, shape):
        pads = tuple((0, t - s) for s, t in zip(x.shape, shape))
        if any(p[1] for p in pads):
            return jnp.pad(x, pads)
        return x

    passage_p = pad_to(passage.astype(cd), (B, Lp_p, I_p))
    question_p = pad_to(question.astype(cd), (B, Lq_p, I_p))
    rep_p = pad_to(rep.astype(cd), (B, Lq_p, R_p))
    w_t = pad_to(u_weight.T.astype(cd), (I_p, H_p))
    d_p = pad_to(d_param.astype(jnp.float32).reshape(1, H), (1, H_p))

    # Additive mask bias: large finite negative on masked / padded question
    # columns (replaces compare+select; avoids the -inf -> NaN path).
    bias = jnp.where(q_mask, jnp.float32(-1e30), jnp.float32(0.0))
    bias = jnp.pad(bias, ((0, 0), (0, Lq_p - Lq)), constant_values=-1e30)
    bias = bias.reshape(B, 1, Lq_p)

    drop_p = None
    if training:
        drop_p = pad_to(drop_mask.astype(cd), (B, 1, I_p))

    bpe = jnp.dtype(cd).itemsize
    obpe = jnp.dtype(out_dtype).itemsize
    inv1 = pl.Buffered(1)  # single-buffer grid-/batch-invariant inputs

    # ---- Stage 1: Uq = D * relu(question @ W^T), one grid step per batch. ----
    uq_in_specs = [
        pl.BlockSpec((1, Lq_p, I_p), lambda b: (b, 0, 0)),                       # question
        pl.BlockSpec((I_p, H_p), lambda b: (0, 0), pipeline_mode=inv1),          # W^T
        pl.BlockSpec((1, H_p), lambda b: (0, 0), pipeline_mode=inv1),            # D
    ]
    uq_args = [question_p, w_t, d_p]
    if training:
        uq_in_specs.append(pl.BlockSpec((1, 1, I_p), lambda b: (b, 0, 0),
                                        pipeline_mode=inv1))                     # dropout
        uq_args.append(drop_p)

    uq_est = (2 * Lq_p * I_p * bpe + I_p * H_p * bpe + H_p * 4
              + (I_p * bpe if training else 0)
              + 2 * Lq_p * H_p * bpe + 4 * Lq_p * H_p)
    uq_cost = pl.CostEstimate(
        flops=int(2 * B * Lq_p * I_p * H_p),
        transcendentals=0,
        bytes_accessed=int(B * Lq_p * I_p * bpe + I_p * H_p * bpe
                           + B * Lq_p * H_p * bpe))

    uq = pl.pallas_call(
        functools.partial(_uq_project_kernel, apply_dropout=training),
        out_shape=jax.ShapeDtypeStruct((B, Lq_p, H_p), cd),
        grid_spec=pltpu.PrefetchScalarGridSpec(
            num_scalar_prefetch=0, grid=(B,),
            in_specs=uq_in_specs,
            out_specs=pl.BlockSpec((1, Lq_p, H_p), lambda b: (b, 0, 0))),
        compiler_params=pltpu.CompilerParams(
            dimension_semantics=("parallel",),
            vmem_limit_bytes=_vmem_limit_bytes(uq_est)),
        cost_estimate=uq_cost,
    )(*uq_args)

    # ---- Stage 2: fused Up projection + masked softmax + alpha @ rep. ----
    att_in_specs = [
        pl.BlockSpec((1, tlp, I_p), lambda b, l: (b, l, 0)),                      # passage
        pl.BlockSpec((I_p, H_p), lambda b, l: (0, 0), pipeline_mode=inv1),        # W^T
        pl.BlockSpec((1, Lq_p, H_p), lambda b, l: (b, 0, 0), pipeline_mode=inv1),  # Uq
        pl.BlockSpec((1, 1, Lq_p), lambda b, l: (b, 0, 0), pipeline_mode=inv1),   # bias
        pl.BlockSpec((1, Lq_p, R_p), lambda b, l: (b, 0, 0), pipeline_mode=inv1),  # rep
    ]
    att_args = [passage_p, w_t, uq, bias, rep_p]
    if training:
        att_in_specs.append(pl.BlockSpec((1, 1, I_p), lambda b, l: (b, 0, 0),
                                         pipeline_mode=inv1))                     # dropout
        att_args.append(drop_p)

    att_est = (2 * tlp * I_p * bpe            # passage (double-buffered)
               + I_p * H_p * bpe              # W (single)
               + Lq_p * H_p * bpe             # Uq (single)
               + Lq_p * 4                     # bias (single, f32)
               + Lq_p * R_p * bpe             # rep (single)
               + (I_p * bpe if training else 0)
               + 2 * tlp * R_p * obpe         # output (double-buffered)
               + 4 * tlp * H_p                # Up f32
               + 2 * 4 * tlp * Lq_p           # scores / e f32
               + 4 * tlp * R_p)               # f32 output accumulator
    att_cost = pl.CostEstimate(
        flops=int(2 * B * (Lp_p * I_p * H_p + Lp_p * H_p * Lq_p
                           + Lp_p * Lq_p * R_p)),
        transcendentals=int(B * Lp_p * Lq_p),
        bytes_accessed=int(B * Lp_p * I_p * bpe + I_p * H_p * bpe
                           + B * Lq_p * H_p * bpe + B * Lq_p * 4
                           + B * Lq_p * R_p * bpe + B * Lp_p * R_p * obpe))

    approx_recip = bool(jnp.dtype(cd) != jnp.dtype(jnp.float32))
    out = pl.pallas_call(
        functools.partial(_full_attention_kernel, apply_dropout=training,
                          approx_recip=approx_recip),
        out_shape=jax.ShapeDtypeStruct((B, Lp_p, R_p), out_dtype),
        grid_spec=pltpu.PrefetchScalarGridSpec(
            num_scalar_prefetch=0, grid=(B, n_lp_tiles),
            in_specs=att_in_specs,
            out_specs=pl.BlockSpec((1, tlp, R_p), lambda b, l: (b, l, 0))),
        compiler_params=pltpu.CompilerParams(
            dimension_semantics=("parallel", "parallel"),
            vmem_limit_bytes=_vmem_limit_bytes(att_est)),
        cost_estimate=att_cost,
    )(*att_args)

    if Lp_p != Lp or R_p != R:
        out = out[:, :Lp, :R]
    return out


def full_attention_forward(passage, p_mask, question, q_mask, rep,
                           u_weight, d_param, dropout, is_training, rng=None, **kw):
    """Full forward. Variational dropout mask is generated here (RNG) but applied
    inside the kernels (fused), matching the PyTorch module: same (B,1,I) mask for
    passage and question, pre-scaled by 1/keep_prob."""
    drop_mask = None
    if is_training and dropout > 0.0:
        keep_prob = 1.0 - dropout
        B, _, I = passage.shape
        u = jax.random.uniform(rng, (B, 1, I), dtype=jnp.float32)
        drop_mask = jnp.floor(keep_prob + u) / keep_prob     # pre-scaled keep mask
    return full_attention_pallas(passage, q_mask, question, rep, u_weight, d_param,
                                 drop_mask=drop_mask, **kw)


def _reference(passage, q_mask, question, rep, u_weight, d_param):
    up = jax.nn.relu(jnp.einsum("bli,hi->blh", passage, u_weight))
    uq = jax.nn.relu(jnp.einsum("bli,hi->blh", question, u_weight)) * d_param
    scores = jnp.einsum("bph,bqh->bpq", up, uq)
    scores = jnp.where(q_mask[:, None, :], -jnp.inf, scores)
    alpha = jax.nn.softmax(scores, axis=2)
    return jnp.einsum("bpq,bqr->bpr", alpha, rep)


if __name__ == "__main__":
    key = jax.random.PRNGKey(0)
    B, Lp, Lq = 2, 16, 8
    input_size, hidden_size, rep_size = 32, 32, 32
    dropout = 0.2

    k1, k2, k3, k4, k5 = jax.random.split(key, 5)

    passage = jax.random.normal(k1, (B, Lp, input_size), dtype=jnp.float32)
    question = jax.random.normal(k2, (B, Lq, input_size), dtype=jnp.float32)
    rep = jax.random.normal(k3, (B, Lq, rep_size), dtype=jnp.float32)

    # p_mask unused by the module's forward; q_mask: True = padded position.
    p_mask = jnp.zeros((B, Lp), dtype=bool)
    q_mask = jnp.arange(Lq)[None, :] >= jnp.array([Lq, Lq - 2])[:, None]

    # Deterministic parameter init (matches __init__ shapes):
    #   U.weight : (hidden_size, input_size), xavier_uniform; D : (1, hidden_size) ones.
    bound = (6.0 / (input_size + hidden_size)) ** 0.5
    u_weight = jax.random.uniform(k4, (hidden_size, input_size),
                                  minval=-bound, maxval=bound, dtype=jnp.float32)
    d_param = jnp.ones((1, hidden_size), dtype=jnp.float32)

    ref = _reference(passage, q_mask, question, rep, u_weight, d_param)

    # Inference, f32 compute path — tight check against the pure-JAX reference.
    out32 = full_attention_forward(passage, p_mask, question, q_mask, rep,
                                   u_weight, d_param, dropout, is_training=False,
                                   compute_dtype=jnp.float32)
    out32 = jax.block_until_ready(out32)
    assert out32.shape == (B, Lp, rep_size)
    assert jnp.allclose(out32, ref, atol=5e-3, rtol=5e-3), "f32 mismatch vs reference"

    # Inference, default bf16 compute path — looser check (bf16 input rounding).
    out16 = full_attention_forward(passage, p_mask, question, q_mask, rep,
                                   u_weight, d_param, dropout, is_training=False)
    out16 = jax.block_until_ready(out16)
    assert out16.shape == (B, Lp, rep_size)
    assert jnp.allclose(out16, ref, atol=8e-2, rtol=8e-2), "bf16 mismatch vs reference"

    # Training path also runs (fused variational dropout with a fixed key).
    out_train = full_attention_forward(passage, p_mask, question, q_mask, rep,
                                       u_weight, d_param, dropout,
                                       is_training=True, rng=k5)
    jax.block_until_ready(out_train)

    print("KERNEL_OK")
</pallas_src>

<mosaic_0001>
module attributes {stable_mosaic.version = 11 : i64} {
  func.func @_uq_project_kernel(%arg0: i32, %arg1: memref<1x128x128xf32, #tpu.memory_space<vmem>>, %arg2: memref<128x128xf32, #tpu.memory_space<vmem>>, %arg3: memref<1x128xf32, #tpu.memory_space<vmem>>, %arg4: memref<1x128x128xf32, #tpu.memory_space<vmem>>) attributes {dimension_semantics = [#tpu.dimension_semantics<parallel>], iteration_bounds = array<i64: 2>, scalar_prefetch = 0 : i64, scratch_operands = 0 : i64, tpu.core_type = #tpu.core_type<tc>, window_params = [{transform_indices = @transform_0, window_bounds = array<i64: 1, 128, 128>}, {pipeline_mode = #tpu.pipeline_mode<synchronous>, transform_indices = @transform_1, window_bounds = array<i64: 128, 128>}, {pipeline_mode = #tpu.pipeline_mode<synchronous>, transform_indices = @transform_2, window_bounds = array<i64: 1, 128>}, {transform_indices = @transform_3, window_bounds = array<i64: 1, 128, 128>}]} {
    %c0 = arith.constant 0 : index
    %c0_0 = arith.constant 0 : index
    %c0_1 = arith.constant 0 : index
    %0 = vector.load %arg1[%c0, %c0_0, %c0_1] : memref<1x128x128xf32, #tpu.memory_space<vmem>>, vector<1x128x128xf32>
    %1 = vector.shape_cast %0 : vector<1x128x128xf32> to vector<128x128xf32>
    %c0_2 = arith.constant 0 : index
    %c0_3 = arith.constant 0 : index
    %2 = vector.load %arg2[%c0_2, %c0_3] : memref<128x128xf32, #tpu.memory_space<vmem>>, vector<128x128xf32>
    %cst = arith.constant dense<0.000000e+00> : vector<128x128xf32>
    %3 = tpu.matmul %1, %2, %cst {dimension_numbers = #tpu.dot_dimension_numbers<[1], [0], [0], [1], [0, 0, 1, 1], [], []>} : vector<128x128xf32>, vector<128x128xf32>, vector<128x128xf32> -> vector<128x128xf32>
    %cst_4 = arith.constant 0.000000e+00 : f32
    %4 = vector.broadcast %cst_4 : f32 to vector<128x128xf32>
    %5 = arith.maximumf %3, %4 : vector<128x128xf32>
    %c0_5 = arith.constant 0 : index
    %c0_6 = arith.constant 0 : index
    %6 = vector.load %arg3[%c0_5, %c0_6] : memref<1x128xf32, #tpu.memory_space<vmem>>, vector<1x128xf32>
    %7 = vector.broadcast %6 : vector<1x128xf32> to vector<128x128xf32>
    %8 = arith.mulf %5, %7 : vector<128x128xf32>
    %c0_7 = arith.constant 0 : index
    %c0_8 = arith.constant 0 : index
    %c0_9 = arith.constant 0 : index
    %9 = vector.load %arg4[%c0_7, %c0_8, %c0_9] : memref<1x128x128xf32, #tpu.memory_space<vmem>>, vector<1x128x128xf32>
    %10 = vector.shape_cast %9 : vector<1x128x128xf32> to vector<128x128xf32>
    %11 = vector.shape_cast %8 : vector<128x128xf32> to vector<1x128x128xf32>
    tpu.vector_store %arg4[%c0_7, %c0_8, %c0_9], %11 {strides = array<i32>} : memref<1x128x128xf32, #tpu.memory_space<vmem>>, vector<1x128x128xf32>,
    return
  }
  func.func @transform_0(%arg0: i32) -> (i32, i32, i32) {
    %c0_i32 = arith.constant 0 : i32
    %c0_i32_0 = arith.constant 0 : i32
    %c0_i32_1 = arith.constant 0 : i32
    return %arg0, %c0_i32, %c0_i32_0 : i32, i32, i32
  }
  func.func @transform_1(%arg0: i32) -> (i32, i32) {
    %c0_i32 = arith.constant 0 : i32
    %c0_i32_0 = arith.constant 0 : i32
    %c0_i32_1 = arith.constant 0 : i32
    return %c0_i32, %c0_i32_0 : i32, i32
  }
  func.func @transform_2(%arg0: i32) -> (i32, i32) {
    %c0_i32 = arith.constant 0 : i32
    %c0_i32_0 = arith.constant 0 : i32
    %c0_i32_1 = arith.constant 0 : i32
    return %c0_i32, %c0_i32_0 : i32, i32
  }
  func.func @transform_3(%arg0: i32) -> (i32, i32, i32) {
    %c0_i32 = arith.constant 0 : i32
    %c0_i32_0 = arith.constant 0 : i32
    %c0_i32_1 = arith.constant 0 : i32
    return %arg0, %c0_i32, %c0_i32_0 : i32, i32, i32
  }
}

</mosaic_0001>

<bundles_post_ra>
// kernel: tpu_custom_call.1
= control target key start
LH: loop header
LB: loop body
LE: loop exit
PB: predicated region body
PF: predicated region fallthrough
CT: control target
= control target key end

     0   :  { %8 = vsyncpa [#allocation3], 0  ;;  %s1175_s0 = inlined_call_operand.hbm [shape: f32[2,128,128], index: 0, kind: input, shape index: {}]   ;;  %s1176_s1 = inlined_call_operand.hbm [shape: f32[128,128], index: 1, kind: input, shape index: {}]   ;;  %s1177_s2 = inlined_call_operand.vmem [shape: f32[1,128], index: 2, kind: input, shape index: {}]   ;;  %s1178_s3 = inlined_call_operand.hbm [shape: f32[2,128,128], index: 3, kind: output, shape index: {}]  }
   0x1   :  { %10 = vsyncpa [#allocation3 + $0x1], 0 }
   0x2   :  { %11 = vsyncpa [#allocation6], 0 }
   0x3   :  { %12 = vsyncpa [#allocation4], 0 }
   0x4   :  { %14 = vsyncpa [#allocation4 + $0x1], 0  ;;  %s906_s12 = smov 0   ;;  %s908_s13 = smov 0  }
   0x5   :  { %s910_s14 = smov 0   ;;  %s912_s15 = smov 0  }
   0x6 LB: > { %s927_s16 = sadd.s32 4294967295, %s877_s15   ;;  %s533_s17 = sadd.s32 4294967294, %s877_s15   ;;  %s877_s15 = sphi %s912_s15, %s1198_s15   ;;  %s873_s14 = sphi %s910_s14, %s1197_s14   ;;  %s869_s13 = sphi %s908_s13, %s1196_s13   ;;  %s865_s12 = sphi %s906_s12, %s1195_s12  }
   0x7   : > { %p40_p0 = scmp.ne.s32.totalorder %s869_s13, %s865_s12  ;;  %p1179_p1 = scmp.eq.s32.totalorder %s927_s16, 0 }
   0x8   : > { %p112_p3 = scmp.eq.s32.totalorder %s533_s17, 1  ;;  %p534_p5 = scmp.ge.s32.totalorder %s877_s15, 1 }
   0x9   : > { %p936_p4 = por %p1179_p1, %p40_p0  ;;  %p119_p7 = scmp.lt.s32.totalorder %s877_s15, 3 }
   0xa   : > { %p941_p6 = por %p112_p3, %p40_p0  ;;  %s879_s21 = smov [#allocation5]  }
   0xb   : > { %s1182_s18 = scalar_select %p936_p4, 1, 0 }
   0xc   : > { %s1183_s19 = scalar_select %p941_p6, 1, 0 }
   0xd   : > { %p946_p8 = pnand %p534_p5, %p119_p7  ;;  %s131_s22 = sshll.u32 %s879_s21, 4  ;;  %s950_s22 = int_to_ptr.vmem [resolvable:$true] %s131_s22 }
   0xe   : > { %s962_s24 = sadd.s32 1, %s877_s15   ;;  %s27_s25 = sadd.s32 1, %s873_s14 }
   0xf   : > { %s1184_s20 = scalar_select %p946_p8, 1, 0 }
  0x10   : > { %p696_p9 = pneg %p946_p8  ;;  %s24_s26 = ssub.s32 %s877_s15, %s962_s24 }
  0x11   : > { %s749_s29 = scalar_lea.hbm %s1176_s1, 2048 }
  0x12   : > { %p957_p11 = pnand %p696_p9, %p1179_p1  ;;  %p750_p12 = scmp.ne.s32.totalorder %s1176_s1, %s749_s29 }
  0x13   : > { %p756_p5 = scmp.lt.u32.totalorder %s749_s29, %s1176_s1 }
  0x14   : > { %p751_p13 = pneg %p957_p11 }
  0x16   : > { %p752_p0 = pnand %p751_p13, %p750_p12 }
  0x18   : > { %p753_p3 = pneg %p752_p0 }
  0x1a   : > { %p758_p7 = pnand %p756_p5, %p753_p3 }
  0x1c   : > { %761 = shalt.err (!%p758_p7)
}
  0x1d   : > { %s762_s7 = scalar_lea.vmem %s950_s22, 2048  ;;  %p770_p2 = scmp.lt.s32.totalorder %s950_s22, %s950_s22 }
  0x1e   : > { %p763_p9 = scmp.ne.s32.totalorder %s950_s22, %s762_s7  ;;  %p771_p6 = scmp.lt.s32.totalorder %s762_s7, %s762_s7 }
  0x20   : > { %p765_p10 = pnand %p763_p9, %p751_p13  ;;  %p772_p4 = por %p771_p6, %p770_p2 }
  0x22   : > { %p766_p1 = pneg %p765_p10 }
  0x24   : > { %p773_p8 = pnand %p772_p4, %p766_p1 }
  0x26   : > { %776 = shalt.err (!%p773_p8)
}
  0x27   : > { %s880_s8 = smov 128   ;;  %s881_s9 = smov 8  }
  0x28   : > { %699 = dma.hbm_to_vmem [thread:$0]  (!%p957_p11), %s1176_s1, 2048, %s950_s22, [#allocation6], %s880_s8, %s880_s8, %s881_s9  }
  0x29   : > { %p25_p1 = scmp.eq.s32.totalorder %s24_s26, 0  ;;  %p34_p2 = scmp.ne.s32.totalorder %s873_s14, %s869_s13 }
  0x2a   : > { %p35_p4 = scmp.eq.s32.totalorder %s877_s15, 0  ;;  %p709_p6 = scmp.lt.s32.totalorder %s877_s15, 2 }
  0x2b   : > { %s996_s17 = scalar_select %p25_p1, %s873_s14, %s27_s25  }
  0x2c   : > { %p36_p8 = por %p35_p4, %p34_p2  ;;  %p1186_p10 = scmp.eq.s32.totalorder %s927_s16, 1 }
  0x2d   : > { %s148_s23 = sand.u32 1, %s873_s14   ;;  %s550_s27 = sshll.u32 %s877_s15, 11 }
  0x2e   : > { %p1000_p12 = por %p1186_p10, %p34_p2  ;;  %s537_s28 = sshll.u32 %s148_s23, 7 }
  0x2f   : > { %s1009_s4 = scalar_lea.hbm %s1175_s0, %s550_s27  ;;  %s152_s22 = scalar_lea.vmem [#allocation2], %s537_s28 }
  0x30   : > { %s159_s25 = sshll.u32 %s152_s22, 4  ;;  %p1011_p11 = pnand %p709_p6, %p36_p8  ;;  %s1015_s25 = int_to_ptr.vmem [resolvable:$true] %s159_s25 }
  0x31   : > { %s1017_s5 = scalar_lea.sflag [#allocation3], %s148_s23  ;;  %s777_s6 = scalar_lea.hbm %s1009_s4, 2048 }
  0x32   : > { %p778_p13 = scmp.ne.s32.totalorder %s1009_s4, %s777_s6  ;;  %p779_p0 = pneg %p1011_p11 }
  0x33   : > { %s782_s11 = scalar_lea.hbm %s1175_s0, 4096  ;;  %p783_p7 = scmp.lt.u32.totalorder %s1009_s4, %s1175_s0 }
  0x34   : > { %p780_p3 = pnand %p779_p0, %p778_p13  ;;  %p784_p9 = scmp.lt.u32.totalorder %s782_s11, %s777_s6 }
  0x35   : > { %p786_p2 = scmp.lt.u32.totalorder %s777_s6, %s1009_s4 }
  0x36   : > { %p781_p5 = pneg %p780_p3  ;;  %p785_p1 = por %p784_p9, %p783_p7 }
  0x38   : > { %p787_p4 = por %p786_p2, %p785_p1 }
  0x3a   : > { %p788_p6 = pnand %p787_p4, %p781_p5 }
  0x3c   : > { %791 = shalt.err (!%p788_p6)
}
  0x3d   : > { %s792_s23 = scalar_lea.vmem %s1015_s25, 2048  ;;  %s882_s29 = smov [#allocation2]  }
  0x3e   : > { %p793_p8 = scmp.ne.s32.totalorder %s1015_s25, %s792_s23  ;;  %s797_s30 = sshll.u32 %s882_s29, 4  ;;  %s798_s30 = int_to_ptr.vmem [resolvable:$false] %s797_s30 }
  0x3f   : > { %s799_s22 = scalar_lea.vmem %s798_s30, 4096  ;;  %p800_p3 = scmp.lt.s32.totalorder %s1015_s25, %s798_s30 }
  0x40   : > { %p795_p10 = pnand %p793_p8, %p779_p0  ;;  %p801_p7 = scmp.lt.s32.totalorder %s799_s22, %s792_s23 }
  0x42   : > { %p796_p13 = pneg %p795_p10  ;;  %p802_p9 = por %p801_p7, %p800_p3 }
  0x44   : > { %p803_p1 = pnand %p802_p9, %p796_p13 }
  0x46   : > { %806 = shalt.err (!%p803_p1)
}
  0x47   : > { %703 = dma.hbm_to_vmem [thread:$0]  (!%p1011_p11), %s1009_s4, 2048, %s1015_s25, %s1017_s5, %s880_s8, %s880_s8, %s881_s9  }
  0x48   : > { %p1189_p0 = scmp.ne.s32.totalorder %s1184_s20, 0 }
  0x49   : > { %s1051_s6 = sand.u32 (!%p1189_p0), 1, %s869_s13   ;;  %p1190_p5 = scmp.ne.s32.totalorder (!%p1189_p0), %s1182_s18, 0 }
  0x4a   : > { %171 = sbr.rel (%p1189_p0) target bundleno = 364 (0x16c), region = 32  ;;  %s541_s7 = sshll.u32 (!%p1189_p0), %s1051_s6, 7 }
  0x4b   : > { %s174_s10 = scalar_lea.sflag (!%p1189_p0), [#allocation3], %s1051_s6  ;;  %s1057_s26 = scalar_lea.vmem (!%p1189_p0), [#allocation2], %s541_s7 }
  0x51   : > { %852 = dma.done.wait (%p1190_p5), %s174_s10, 2048  }
  0x52   : > { %854 = vsyncadd (%p1190_p5), %s174_s10, 4294965248  ;;  %p1191_p11 = scmp.eq.s32.totalorder %s927_s16, 0 }
  0x54   : > { %856 = dma.done.wait (%p1191_p11), [#allocation6], 2048   ;;  %p1192_p2 = pmov %p1191_p11 }
  0x55   : > { %v220_v0 = vld [vmem:[#allocation5] sm:$0xff]  ;;  %v221_v1 = vld [vmem:[#allocation5 + $0x8] sm:$0xff]  ;;  %v222_v2 = vld [vmem:[#allocation5 + $0x10] sm:$0xff]  ;;  %s1094_s8 = scalar_lea.vmem [#allocation7], %s541_s7  ;;  %s551_s9 = sshll.u32 %s927_s16, 11 }
  0x56   : > { %858 = vsyncadd (%p1192_p2), [#allocation6], 4294965248  ;;  %v640_v3 = vpack.c.bf16 %v221_v1, %v220_v0  ;;  %v223_v4 = vld [vmem:[#allocation5 + $0x18] sm:$0xff]  ;;  %v224_v6 = vld [vmem:[#allocation5 + $0x20] sm:$0xff]  ;;  %s450_s4 = sshll.u32 %s1094_s8, 4  ;;  %s1123_s5 = scalar_lea.hbm %s1178_s3, %s551_s9  ;;  %s1125_s4 = int_to_ptr.vmem [resolvable:$true] %s450_s4 }
  0x57   : > { %v644_v5 = vpack.c.bf16 %v223_v4, %v222_v2  ;;  %v225_v7 = vld [vmem:[#allocation5 + $0x28] sm:$0xff]  ;;  %v204_v9 = vld [vmem:[%s1057_s26] sm:$0xff]  ;;  %v226_v11 = vld [vmem:[#allocation5 + $0x30] sm:$0xff]  ;;  %s437_s11 = scalar_lea.sflag [#allocation4], %s1051_s6  ;;  %s807_s27 = scalar_lea.vmem %s1125_s4, 2048 }
  0x58   : > { %641 = vmatprep.subr.bf16.mxu0 %v640_v3  ;;  %672 = vmatprep.subr.bf16.mxu1 %v640_v3  ;;  %v648_v8 = vpack.c.bf16 %v225_v7, %v224_v6  ;;  %v212_v10 = vld [vmem:[%s1057_s26 + $0x40] sm:$0xff]  ;;  %v227_v12 = vld [vmem:[#allocation5 + $0x38] sm:$0xff]  ;;  %v229_v15 = vld [vmem:[#allocation5 + $0x48] sm:$0xff]  ;;  %p808_p4 = scmp.ne.s32.totalorder %s1125_s4, %s807_s27  ;;  %s883_s28 = smov [#allocation7]  }
  0x59   : > { %643 = vmatpush3.bf16.msra.mxu0 %v640_v3  ;;  %680 = vmatpush3.bf16.msra.mxu1 %v640_v3  ;;  %v652_v13 = vpack.c.bf16 %v227_v12, %v226_v11  ;;  %v228_v14 = vld [vmem:[#allocation5 + $0x40] sm:$0xff]  ;;  %v230_v17 = vld [vmem:[#allocation5 + $0x50] sm:$0xff]  ;;  %v231_v18 = vld [vmem:[#allocation5 + $0x58] sm:$0xff]  ;;  %s811_s23 = sshll.u32 %s883_s28, 4  ;;  %s812_s23 = int_to_ptr.vmem [resolvable:$false] %s811_s23 }
  0x5a   : > { %645 = vmatprep.subr.bf16.mxu0 %v644_v5  ;;  %673 = vmatprep.subr.bf16.mxu1 %v644_v5  ;;  %v656_v16 = vpack.c.bf16 %v229_v15, %v228_v14  ;;  %v660_v19 = vpack.c.bf16 %v231_v18, %v230_v17  ;;  %v232_v20 = vld [vmem:[#allocation5 + $0x60] sm:$0xff]  ;;  %v233_v21 = vld [vmem:[#allocation5 + $0x68] sm:$0xff]  ;;  %v234_v23 = vld [vmem:[#allocation5 + $0x70] sm:$0xff]  ;;  %p809_p6 = pnand %p808_p4, %p1000_p12  ;;  %s813_s29 = scalar_lea.vmem %s812_s23, 4096 }
  0x5b   : > { %616 = vmatprep.mubr.f32.mxu0 %v204_v9  ;;  %628 = vmatprep.mubr.f32.mxu1 %v212_v10  ;;  %v664_v22 = vpack.c.bf16 %v233_v21, %v232_v20  ;;  %v235_v24 = vld [vmem:[#allocation5 + $0x78] sm:$0xff]  ;;  %v205_v26 = vld [vmem:[%s1057_s26 + $0x8] sm:$0xff]  ;;  %v206_v28 = vld [vmem:[%s1057_s26 + $0x10] sm:$0xff]  ;;  %p814_p10 = scmp.lt.s32.totalorder %s1125_s4, %s812_s23  ;;  %p815_p13 = scmp.lt.s32.totalorder %s813_s29, %s807_s27 }
  0x5c   : > { %v668_v25 = vpack.c.bf16 %v235_v24, %v234_v23  ;;  %v213_v27 = vld [vmem:[%s1057_s26 + $0x48] sm:$0xff]  ;;  %v214_v29 = vld [vmem:[%s1057_s26 + $0x50] sm:$0xff]  ;;  %v207_v30 = vld [vmem:[%s1057_s26 + $0x18] sm:$0xff]  ;;  %p810_p8 = pneg %p809_p6 }
  0x5d   : > { %647 = vmatpush3.bf16.msra.mxu0 %v644_v5  ;;  %681 = vmatpush3.bf16.msra.mxu1 %v644_v5  ;;  %v215_v31 = vld [vmem:[%s1057_s26 + $0x58] sm:$0xff]  ;;  %v208_v32 = vld [vmem:[%s1057_s26 + $0x20] sm:$0xff]  ;;  %v209_v34 = vld [vmem:[%s1057_s26 + $0x28] sm:$0xff]  ;;  %p816_p3 = por %p815_p13, %p814_p10 }
  0x5e   : > { %649 = vmatprep.subr.bf16.mxu0 %v648_v8  ;;  %674 = vmatprep.subr.bf16.mxu1 %v648_v8  ;;  %v216_v33 = vld [vmem:[%s1057_s26 + $0x60] sm:$0xff]  ;;  %v217_v35 = vld [vmem:[%s1057_s26 + $0x68] sm:$0xff]  ;;  %v210_v36 = vld [vmem:[%s1057_s26 + $0x30] sm:$0xff] }
  0x5f   : > { %v218_v37 = vld [vmem:[%s1057_s26 + $0x70] sm:$0xff]  ;;  %v211_v38 = vld [vmem:[%s1057_s26 + $0x38] sm:$0xff]  ;;  %v1086_v41 = vld [vmem:[%s1177_s2] ss:$0 sm:$0xff]  ;;  %p817_p7 = pnand %p816_p3, %p810_p8 }
  0x60   : > { %v219_v39 = vld [vmem:[%s1057_s26 + $0x78] sm:$0xff] }
  0x61   : > { %651 = vmatpush3.bf16.msra.mxu0 %v648_v8  ;;  %682 = vmatpush3.bf16.msra.mxu1 %v648_v8 }
  0x62   : > { %653 = vmatprep.subr.bf16.mxu0 %v652_v13  ;;  %675 = vmatprep.subr.bf16.mxu1 %v652_v13 }
  0x65   : > { %655 = vmatpush3.bf16.msra.mxu0 %v652_v13  ;;  %683 = vmatpush3.bf16.msra.mxu1 %v652_v13 }
  0x66   : > { %657 = vmatprep.subr.bf16.mxu0 %v656_v16  ;;  %676 = vmatprep.subr.bf16.mxu1 %v656_v16 }
  0x69   : > { %659 = vmatpush3.bf16.msra.mxu0 %v656_v16  ;;  %684 = vmatpush3.bf16.msra.mxu1 %v656_v16 }
  0x6a   : > { %661 = vmatprep.subr.bf16.mxu0 %v660_v19  ;;  %677 = vmatprep.subr.bf16.mxu1 %v660_v19 }
  0x6d   : > { %663 = vmatpush3.bf16.msra.mxu0 %v660_v19  ;;  %685 = vmatpush3.bf16.msra.mxu1 %v660_v19 }
  0x6e   : > { %665 = vmatprep.subr.bf16.mxu0 %v664_v22  ;;  %678 = vmatprep.subr.bf16.mxu1 %v664_v22 }
  0x71   : > { %667 = vmatpush3.bf16.msra.mxu0 %v664_v22  ;;  %686 = vmatpush3.bf16.msra.mxu1 %v664_v22 }
  0x72   : > { %669 = vmatprep.subr.bf16.mxu0 %v668_v25  ;;  %679 = vmatprep.subr.bf16.mxu1 %v668_v25 }
  0x75   : > { %671 = vmatpush3.bf16.msra.mxu0 %v668_v25  ;;  %687 = vmatpush3.bf16.msra.mxu1 %v668_v25 }
  0x78   : > { %617 = vmatmul.mubr.f32.vlgmr.msra.gmra.mrb[0].mxu0 %v205_v26  ;;  %629 = vmatmul.mubr.f32.vlgmr.msra.gmra.mrb[0].mxu1 %v213_v27 }
  0x79   : > { %619 = vmatprep.mubr.f32.mxu0 %v206_v28  ;;  %631 = vmatprep.mubr.f32.mxu1 %v214_v29 }
  0x7c   : > { %620 = vmatmul.mubr.f32.gmra.mrb[2].mxu0 %v207_v30  ;;  %632 = vmatmul.mubr.f32.gmra.mrb[2].mxu1 %v215_v31 }
  0x7d   : > { %622 = vmatprep.mubr.f32.mxu0 %v208_v32  ;;  %634 = vmatprep.mubr.f32.mxu1 %v216_v33 }
  0x80   : > { %623 = vmatmul.mubr.f32.gmra.mrb[4].mxu0 %v209_v34  ;;  %635 = vmatmul.mubr.f32.gmra.mrb[4].mxu1 %v217_v35 }
  0x81   : > { %625 = vmatprep.mubr.f32.mxu0 %v210_v36  ;;  %637 = vmatprep.mubr.f32.mxu1 %v218_v37 }
  0x84   : > { %626 = vmatmul.mubr.f32.gmra.mrb[6].mxu0 %v211_v38  ;;  %638 = vmatmul.mubr.f32.gmra.mrb[6].mxu1 %v219_v39 }
 0x14b   : > { %v618_v40 = vpop.f32.mrb[0].mxu0  ;;  %v630_v42 = vpop.f32.mrb[0].mxu1 }
 0x14c   : > { %v382_v43 = vmax.f32 %v618_v40, 0.0  ;;  %v390_v44 = vmax.f32 %v630_v42, 0.0  ;;  %v302_v45 = vpop.f32.mrb[1].mxu0  ;;  %v342_v46 = vpop.f32.mrb[1].mxu1 }
 0x14d   : > { %v381_v47 = vmax.f32 %v302_v45, 0.0  ;;  %v389_v48 = vmax.f32 %v342_v46, 0.0 }
 0x14e   : > { %v405_v49 = vmul.f32 %v1086_v41, %v382_v43  ;;  %v413_v50 = vmul.f32 %v1086_v41, %v390_v44 }
 0x14f   : > { %v404_v51 = vmul.f32 %v1086_v41, %v381_v47  ;;  %v412_v52 = vmul.f32 %v1086_v41, %v389_v48  ;;  %v621_v53 = vpop.f32.mrb[2].mxu0  ;;  %v633_v54 = vpop.f32.mrb[2].mxu1 }
 0x150   : > { %421 = vst [vmem:[%s1094_s8 + $0x8] sm:$0xff] %v405_v49  ;;  %429 = vst [vmem:[%s1094_s8 + $0x48] sm:$0xff] %v413_v50  ;;  %v384_v55 = vmax.f32 %v621_v53, 0.0  ;;  %v392_v56 = vmax.f32 %v633_v54, 0.0  ;;  %v312_v57 = vpop.f32.mrb[3].mxu0  ;;  %v352_v58 = vpop.f32.mrb[3].mxu1 }
 0x151   : > { %420 = vst [vmem:[%s1094_s8] sm:$0xff] %v404_v51  ;;  %428 = vst [vmem:[%s1094_s8 + $0x40] sm:$0xff] %v412_v52  ;;  %v383_v59 = vmax.f32 %v312_v57, 0.0  ;;  %v391_v60 = vmax.f32 %v352_v58, 0.0 }
 0x152   : > { %v407_v61 = vmul.f32 %v1086_v41, %v384_v55  ;;  %v415_v62 = vmul.f32 %v1086_v41, %v392_v56 }
 0x153   : > { %v406_v63 = vmul.f32 %v1086_v41, %v383_v59  ;;  %v414_v0 = vmul.f32 %v1086_v41, %v391_v60  ;;  %v624_v1 = vpop.f32.mrb[4].mxu0  ;;  %v636_v2 = vpop.f32.mrb[4].mxu1 }
 0x154   : > { %423 = vst [vmem:[%s1094_s8 + $0x18] sm:$0xff] %v407_v61  ;;  %431 = vst [vmem:[%s1094_s8 + $0x58] sm:$0xff] %v415_v62  ;;  %v386_v3 = vmax.f32 %v624_v1, 0.0  ;;  %v394_v4 = vmax.f32 %v636_v2, 0.0  ;;  %v322_v5 = vpop.f32.mrb[5].mxu0  ;;  %v362_v6 = vpop.f32.mrb[5].mxu1 }
 0x155   : > { %422 = vst [vmem:[%s1094_s8 + $0x10] sm:$0xff] %v406_v63  ;;  %430 = vst [vmem:[%s1094_s8 + $0x50] sm:$0xff] %v414_v0  ;;  %v385_v7 = vmax.f32 %v322_v5, 0.0  ;;  %v393_v8 = vmax.f32 %v362_v6, 0.0 }
 0x156   : > { %v409_v9 = vmul.f32 %v1086_v41, %v386_v3  ;;  %v417_v10 = vmul.f32 %v1086_v41, %v394_v4 }
 0x157   : > { %v408_v11 = vmul.f32 %v1086_v41, %v385_v7  ;;  %v416_v12 = vmul.f32 %v1086_v41, %v393_v8  ;;  %v627_v13 = vpop.f32.mrb[6].mxu0  ;;  %v639_v14 = vpop.f32.mrb[6].mxu1 }
 0x158   : > { %425 = vst [vmem:[%s1094_s8 + $0x28] sm:$0xff] %v409_v9  ;;  %433 = vst [vmem:[%s1094_s8 + $0x68] sm:$0xff] %v417_v10  ;;  %v388_v15 = vmax.f32 %v627_v13, 0.0  ;;  %v396_v16 = vmax.f32 %v639_v14, 0.0  ;;  %v332_v17 = vpop.f32.mrb[7].mxu0  ;;  %v372_v18 = vpop.f32.mrb[7].mxu1 }
 0x159   : > { %424 = vst [vmem:[%s1094_s8 + $0x20] sm:$0xff] %v408_v11  ;;  %432 = vst [vmem:[%s1094_s8 + $0x60] sm:$0xff] %v416_v12  ;;  %v387_v19 = vmax.f32 %v332_v17, 0.0  ;;  %v395_v20 = vmax.f32 %v372_v18, 0.0 }
 0x15a   : > { %v411_v21 = vmul.f32 %v1086_v41, %v388_v15  ;;  %v419_v22 = vmul.f32 %v1086_v41, %v396_v16 }
 0x15b   : > { %v410_v23 = vmul.f32 %v1086_v41, %v387_v19  ;;  %v418_v24 = vmul.f32 %v1086_v41, %v395_v20 }
 0x15c   : > { %427 = vst [vmem:[%s1094_s8 + $0x38] sm:$0xff] %v411_v21  ;;  %435 = vst [vmem:[%s1094_s8 + $0x78] sm:$0xff] %v419_v22 }
 0x15d   : > { %426 = vst [vmem:[%s1094_s8 + $0x30] sm:$0xff] %v410_v23  ;;  %434 = vst [vmem:[%s1094_s8 + $0x70] sm:$0xff] %v418_v24 }
 0x15e   : > { %820 = shalt.err (!%p817_p7)
}
 0x15f   : > { %s821_s30 = scalar_lea.hbm %s1123_s5, 2048  ;;  %s825_s10 = scalar_lea.hbm %s1178_s3, 4096 }
 0x160   : > { %p822_p9 = scmp.ne.s32.totalorder %s1123_s5, %s821_s30  ;;  %p826_p5 = scmp.lt.u32.totalorder %s1123_s5, %s1178_s3 }
 0x161   : > { %p827_p11 = scmp.lt.u32.totalorder %s825_s10, %s821_s30  ;;  %p829_p4 = scmp.lt.u32.totalorder %s821_s30, %s1123_s5 }
 0x162   : > { %p823_p1 = pnand %p822_p9, %p1000_p12 }
 0x163   : > { %p828_p2 = por %p827_p11, %p826_p5 }
 0x164   : > { %p824_p0 = pneg %p823_p1 }
 0x165   : > { %p830_p6 = por %p829_p4, %p828_p2 }
 0x167   : > { %p831_p8 = pnand %p830_p6, %p824_p0 }
 0x169   : > { %834 = shalt.err (!%p831_p8)
}
 0x16a   : > { %s884_s20 = smov 128   ;;  %s885_s8 = smov 8  }
 0x16b   : > { %694 = dma.vmem_to_hbm [thread:$0]  (%p1000_p12), %s1125_s4, 2048, %s1123_s5, %s437_s11, %s884_s20, %s884_s20, %s885_s8  }
 0x16c PF: > { %s465_s9 = sand.u32 1, %s865_s12   ;;  %p1193_p10 = scmp.ne.s32.totalorder %s1183_s19, 0 }
 0x16d   : > { %p1194_p13 = scmp.ge.s32.totalorder %s877_s15, 2  ;;  %s466_s16 = scalar_lea.sflag [#allocation4], %s465_s9 }
 0x16f   : > { %p705_p3 = pnand %p1194_p13, %p1193_p10 }
 0x171   : > { %860 = dma.done.wait (!%p705_p3), %s466_s16, 2048  }
 0x172   : > { %862 = vsyncadd (!%p705_p3), %s466_s16, 4294965248  ;;  %p17_p7 = scmp.ge.s32.totalorder %s962_s24, 4   ;;  %s1195_s12 = smov %s869_s13 }
 0x173   : > { %s1196_s13 = smov %s873_s14  ;;  %s1197_s14 = smov %s996_s17 }
 0x174   : > { %s1198_s15 = smov %s962_s24  ;;  %19 = sbr.rel (!%p17_p7) target bundleno = 6 (0x6), region = 81 }
 0x17b   :  { %471 = vsyncpa [#allocation3], 1 }
 0x17c   :  { %473 = vsyncpa [#allocation3 + $0x1], 1 }
 0x17d   :  { %474 = vsyncpa [#allocation6], 1 }
 0x17e   :  { %475 = vsyncpa [#allocation4], 1 }
 0x17f   :  { %477 = vsyncpa [#allocation4 + $0x1], 1 }

</bundles_post_ra>
